<compile_context>
chip_gen: v7x
topology: tpu7x:2x2x1
jax: 0.10.0
libtpu: 0.0.40
codegen_flags: <defaults>
</compile_context>

<pallas_src>
import numpy as np
import jax
import jax.numpy as jnp
from jax import lax
from jax.experimental import pallas as pl
from jax.experimental.pallas import tpu as pltpu

_EPS = 1e-8   # torch F.cosine_similarity default eps (clamped per-norm here, see note above)


def _round_up(x, m):
    return ((x + m - 1) // m) * m


def _resident_spec(block_shape, index_map):
    """BlockSpec for a block whose index never changes: single-buffer it (no re-fetch)."""
    try:
        return pl.BlockSpec(block_shape, index_map, pipeline_mode=pl.Buffered(1))
    except (TypeError, AttributeError):
        # Older Pallas without pipeline_mode / Buffered: fall back to default buffering.
        return pl.BlockSpec(block_shape, index_map)


def _make_kernel(B, B_pad, D, TM, nb):
    padded = B_pad != B
    dn = (((1,), (1,)), ((), ()))   # contract last dim of both operands

    def kernel(emb_ref, lab_row_ref, lab_col_ref, out_ref,
               inv_col_ref, rexp_ref, acc_ref):
        phase = pl.program_id(0)          # 0: accumulate r_exp / sum_S ; 1: group totals
        b = pl.program_id(1)              # row-block index
        row0 = pl.multiple_of(b * TM, TM)

        # ---- one-time init on the very first grid step --------------------------------
        @pl.when(jnp.logical_and(phase == 0, b == 0))
        def _init():
            e32 = emb_ref[...].astype(jnp.float32)                      # (B_pad, D)
            # Column squared norms directly in (1, B) lane layout via an MXU matvec:
            #   sq_col[0, j] = sum_d e[j, d]^2
            sq_col = lax.dot_general(jnp.ones((1, D), jnp.float32), e32 * e32, dn,
                                     preferred_element_type=jnp.float32)  # (1, B_pad)
            inv_col_ref[...] = lax.rsqrt(jnp.maximum(sq_col, _EPS * _EPS))
            rexp_ref[...] = jnp.zeros_like(rexp_ref)
            acc_ref[0] = 0.0      # sum of masked S
            acc_ref[1] = 0.0      # sum_i cnt_i * log(group_exp_i)
            acc_ref[2] = 0.0      # total pairs
            out_ref[0, 0] = 0.0

        # ---- same-label mask for this row block (bool only; f32 cast lives in phase 1) --
        m_blk = lab_col_ref[...] == lab_row_ref[...]                    # (TM, B_pad)
        if padded:   # static: only emitted when the batch was zero-padded
            col_ok = lax.broadcasted_iota(jnp.int32, (1, B_pad), 1) < B
            row_ok = (row0 + lax.broadcasted_iota(jnp.int32, (TM, 1), 0)) < B
            m_blk = jnp.logical_and(m_blk, jnp.logical_and(col_ok, row_ok))

        # ---- phase 0: masked exp / S reductions (MXU matmul off the resident input) ----
        @pl.when(phase == 0)
        def _phase0():
            e_rows = emb_ref[pl.ds(row0, TM), :]                        # (TM, D) matmul dtype
            raw = lax.dot_general(e_rows, emb_ref[...], dn,
                                  preferred_element_type=jnp.float32)   # (TM, B_pad)
            er = e_rows.astype(jnp.float32)
            inv_row = lax.rsqrt(jnp.maximum(
                jnp.sum(er * er, axis=1, keepdims=True), _EPS * _EPS))   # (TM, 1)
            s_blk = raw * inv_row * inv_col_ref[...]                     # cosine similarities
            exp_m = jnp.where(m_blk, jnp.exp(s_blk), 0.0)
            # Column partial sums; accumulated over all row blocks this equals
            # r_exp[j] = sum_i M[i,j] * exp(S[i,j]) (mask symmetry, not S symmetry).
            rexp_ref[...] += jnp.sum(exp_m, axis=0, keepdims=True)
            acc_ref[0] += jnp.sum(jnp.where(m_blk, s_blk, 0.0))

        # ---- phase 1: per-group totals on the MXU -> loss accumulation -----------------
        @pl.when(phase == 1)
        def _phase1():
            mf_blk = m_blk.astype(jnp.float32)                           # (TM, B_pad)
            cnt = lax.dot_general(jnp.ones((1, B_pad), jnp.float32), mf_blk, dn,
                                  preferred_element_type=jnp.float32)    # (1, TM)
            grp = lax.dot_general(rexp_ref[...], mf_blk, dn,
                                  preferred_element_type=jnp.float32)    # (1, TM)
            # Padded rows have cnt == 0 and contribute 0 * log(tiny) = 0 (never NaN).
            acc_ref[1] += jnp.sum(cnt * jnp.log(jnp.maximum(grp, 1e-30)))
            acc_ref[2] += jnp.sum(cnt)

            @pl.when(b == nb - 1)
            def _finalize():
                pairs = acc_ref[2]
                loss = acc_ref[1] - acc_ref[0]
                out_ref[0, 0] = jnp.where(pairs > 0.0, loss / pairs, 0.0)

    return kernel


def contrastive_loss(embeddings, labels, *, block_rows=None, matmul_dtype=jnp.bfloat16):
    """embeddings: [B, D] float, labels: [B] int -> scalar float32 loss.

    matmul_dtype=jnp.bfloat16 (default) runs the similarity matmul at native MXU rate
    with f32 accumulation; pass jnp.float32 for tight parity with the PyTorch module.
    block_rows: row-tile size (default 256 for v6e/v7x; 128 is the better fit on v5e).
    """
    B, D = embeddings.shape
    mm_bytes = jnp.dtype(matmul_dtype).itemsize

    try:
        vmem_cap = int(pltpu.get_tpu_info().vmem_capacity_bytes)
    except Exception:
        vmem_cap = 64 * 2**20             # conservative: v7x per-TensorCore VMEM
    vmem_budget = int(0.8 * vmem_cap)     # ~20% headroom

    def vmem_est(tm):
        bp = _round_up(B, tm)
        return (bp * D * (mm_bytes + 8)       # resident emb + one-time f32 init temporaries
                + 3 * 32 * bp                 # lab_row + two (1, B) f32 scratches (8-row padded)
                + 2 * 128 * 4 * tm            # double-buffered (TM, 1) label tile (lane padded)
                + 8 * 4 * tm * bp             # per-step (TM, B) f32 temporaries (headroom)
                + (1 << 20))

    if block_rows is None:
        TM = min(256, _round_up(B, 8))        # 256 rows = native MXU tile on v6e/v7x
        while TM > 8 and vmem_est(TM) > vmem_budget:
            TM //= 2                          # shrink the row tile rather than overflow VMEM
    else:
        TM = max(8, _round_up(block_rows, 8))
    B_pad = _round_up(B, TM)
    nb = B_pad // TM
    vmem_limit = int(min(vmem_budget, max(32 * 2**20, vmem_est(TM))))

    emb = embeddings.astype(matmul_dtype)
    lab = labels.astype(jnp.int32)
    if B_pad != B:                            # zero-pad; padded rows/cols masked in-kernel
        emb = jnp.pad(emb, ((0, B_pad - B), (0, 0)))
        lab = jnp.pad(lab, (0, B_pad - B))
    lab_row = lab.reshape(1, B_pad)           # lane-dense labels (VMEM-resident)
    lab_col = lab.reshape(B_pad, 1)           # streamed as tiny (TM, 1) tiles per row block

    kernel = _make_kernel(B, B_pad, D, TM, nb)
    out = pl.pallas_call(
        kernel,
        out_shape=jax.ShapeDtypeStruct((1, 1), jnp.float32),
        grid=(2, nb),
        in_specs=[
            # Constant-index blocks: single-buffered (never re-fetched).
            _resident_spec((B_pad, D), lambda p, b: (0, 0)),   # embeddings (matmul dtype)
            _resident_spec((1, B_pad), lambda p, b: (0, 0)),   # labels, lane vector
            # Per-block row-label tile: residency ~2*TM*512 B instead of a full (B,1) column.
            pl.BlockSpec((TM, 1), lambda p, b: (b, 0)),
        ],
        out_specs=pl.BlockSpec((1, 1), lambda p, b: (0, 0),
                               memory_space=pltpu.MemorySpace.SMEM),
        scratch_shapes=[
            pltpu.VMEM((1, B_pad), jnp.float32),   # inverse column norms
            pltpu.VMEM((1, B_pad), jnp.float32),   # r_exp accumulator (lane vector)
            pltpu.SMEM((3,), jnp.float32),         # [sum_S, sum cnt*log(grp), pairs]
        ],
        compiler_params=pltpu.CompilerParams(
            # Phase 1 consumes r_exp produced by all of phase 0 -> sequential grid.
            dimension_semantics=("arbitrary", "arbitrary"),
            vmem_limit_bytes=vmem_limit),
    )(emb, lab_row, lab_col)
    return out[0, 0]


def reference_loss(emb, labels):
    """Pure numpy transcription of the PyTorch forward."""
    emb = np.asarray(emb, dtype=np.float64)
    labels = np.asarray(labels)
    eps = 1e-8
    norms = np.sqrt((emb * emb).sum(axis=1))
    S = (emb @ emb.T) / np.maximum(np.outer(norms, norms), eps)
    total_loss = 0.0
    total_pairs = 0
    for label in np.unique(labels):
        m = labels == label
        s = S[np.outer(m, m)].reshape(-1)
        if s.size == 0:
            continue
        ex = np.exp(s)
        total_loss += -np.log(ex / ex.sum()).sum()
        total_pairs += int(m.sum()) ** 2
    if total_pairs == 0:
        return 0.0
    return total_loss / total_pairs


if __name__ == "__main__":
    key = jax.random.PRNGKey(0)
    k_emb, k_lab = jax.random.split(key)
    B, D = 8, 32
    embeddings = jax.random.normal(k_emb, (B, D), dtype=jnp.float32)
    labels = jax.random.randint(k_lab, (B,), 0, 3, dtype=jnp.int32)
    ref = reference_loss(np.asarray(embeddings), np.asarray(labels))

    # Default fast path: bf16 matmul operands, f32 MXU accumulation.
    loss_bf16 = jax.block_until_ready(contrastive_loss(embeddings, labels))
    assert np.allclose(float(loss_bf16), ref, rtol=5e-2, atol=5e-3), (float(loss_bf16), ref)

    # f32 parity mode (tight tolerance against the float64 reference).
    loss_f32 = jax.block_until_ready(
        contrastive_loss(embeddings, labels, matmul_dtype=jnp.float32))
    assert np.allclose(float(loss_f32), ref, rtol=2e-4, atol=2e-5), (float(loss_f32), ref)

    # Non-divisible batch exercises the zero-pad + validity-mask path.
    B2 = 10
    emb2 = jax.random.normal(jax.random.PRNGKey(1), (B2, D), dtype=jnp.float32)
    lab2 = jax.random.randint(jax.random.PRNGKey(2), (B2,), 0, 3, dtype=jnp.int32)
    ref2 = reference_loss(np.asarray(emb2), np.asarray(lab2))
    loss2 = jax.block_until_ready(
        contrastive_loss(emb2, lab2, matmul_dtype=jnp.float32))
    assert np.allclose(float(loss2), ref2, rtol=2e-4, atol=2e-5), (float(loss2), ref2)

    print("KERNEL_OK")
</pallas_src>

<mosaic_0001>
module attributes {stable_mosaic.version = 11 : i64} {
  func.func @kernel(%arg0: i32, %arg1: i32, %arg2: memref<8x32xbf16, #tpu.memory_space<vmem>>, %arg3: memref<1x8xi32, #tpu.memory_space<vmem>>, %arg4: memref<8x1xi32, #tpu.memory_space<vmem>>, %arg5: memref<1x1xf32, #tpu.memory_space<smem>>, %arg6: memref<1x8xf32, #tpu.memory_space<vmem>>, %arg7: memref<1x8xf32, #tpu.memory_space<vmem>>, %arg8: memref<3xf32, #tpu.memory_space<smem>>) attributes {dimension_semantics = [#tpu.dimension_semantics<arbitrary>, #tpu.dimension_semantics<arbitrary>], iteration_bounds = array<i64: 2, 1>, scalar_prefetch = 0 : i64, scratch_operands = 3 : i64, tpu.core_type = #tpu.core_type<tc>, window_params = [{pipeline_mode = #tpu.pipeline_mode<synchronous>, transform_indices = @transform_0, window_bounds = array<i64: 8, 32>}, {pipeline_mode = #tpu.pipeline_mode<synchronous>, transform_indices = @transform_1, window_bounds = array<i64: 1, 8>}, {transform_indices = @transform_2, window_bounds = array<i64: 8, 1>}, {transform_indices = @transform_3, window_bounds = array<i64: 1, 1>}]} {
    %c8_i32 = arith.constant 8 : i32
    %0 = arith.muli %arg1, %c8_i32 : i32
    %1 = tpu.assume_multiple %0, 8 : i32
    %c0_i32 = arith.constant 0 : i32
    %2 = arith.cmpi eq, %arg0, %c0_i32 : i32
    %c0_i32_0 = arith.constant 0 : i32
    %3 = arith.cmpi eq, %arg1, %c0_i32_0 : i32
    %4 = arith.andi %2, %3 : i1
    %5 = arith.extui %4 : i1 to i32
    %c0_i32_1 = arith.constant 0 : i32
    %6 = arith.cmpi ne, %5, %c0_i32_1 : i32
    scf.if %6 {
      %c0_8 = arith.constant 0 : index
      %c0_9 = arith.constant 0 : index
      %18 = vector.load %arg2[%c0_8, %c0_9] : memref<8x32xbf16, #tpu.memory_space<vmem>>, vector<8x32xbf16>
      %19 = arith.extf %18 : vector<8x32xbf16> to vector<8x32xf32>
      %cst = arith.constant 1.000000e+00 : f32
      %20 = vector.broadcast %cst : f32 to vector<1x32xf32>
      %21 = arith.mulf %19, %19 : vector<8x32xf32>
      %cst_10 = arith.constant dense<0.000000e+00> : vector<1x8xf32>
      %22 = tpu.matmul %20, %21, %cst_10 {dimension_numbers = #tpu.dot_dimension_numbers<[1], [1], [0], [0], [0, 0, 1, 0], [], []>} : vector<1x32xf32>, vector<8x32xf32>, vector<1x8xf32> -> vector<1x8xf32>
      %cst_11 = arith.constant 1.000000e-16 : f32
      %23 = vector.broadcast %cst_11 : f32 to vector<1x8xf32>
      %24 = arith.maximumf %22, %23 : vector<1x8xf32>
      %25 = math.rsqrt %24 : vector<1x8xf32>
      %c0_12 = arith.constant 0 : index
      %c0_13 = arith.constant 0 : index
      %26 = vector.load %arg6[%c0_12, %c0_13] : memref<1x8xf32, #tpu.memory_space<vmem>>, vector<1x8xf32>
      tpu.vector_store %arg6[%c0_12, %c0_13], %25 {strides = array<i32>} : memref<1x8xf32, #tpu.memory_space<vmem>>, vector<1x8xf32>,
      %cst_14 = arith.constant 0.000000e+00 : f32
      %27 = vector.broadcast %cst_14 : f32 to vector<1x8xf32>
      %c0_15 = arith.constant 0 : index
      %c0_16 = arith.constant 0 : index
      %28 = vector.load %arg7[%c0_15, %c0_16] : memref<1x8xf32, #tpu.memory_space<vmem>>, vector<1x8xf32>
      tpu.vector_store %arg7[%c0_15, %c0_16], %27 {strides = array<i32>} : memref<1x8xf32, #tpu.memory_space<vmem>>, vector<1x8xf32>,
      %cst_17 = arith.constant 0.000000e+00 : f32
      %c0_18 = arith.constant 0 : index
      %29 = memref.load %arg8[%c0_18] : memref<3xf32, #tpu.memory_space<smem>>
      memref.store %cst_17, %arg8[%c0_18] : memref<3xf32, #tpu.memory_space<smem>>
      %cst_19 = arith.constant 0.000000e+00 : f32
      %c1 = arith.constant 1 : index
      %30 = memref.load %arg8[%c1] : memref<3xf32, #tpu.memory_space<smem>>
      memref.store %cst_19, %arg8[%c1] : memref<3xf32, #tpu.memory_space<smem>>
      %cst_20 = arith.constant 0.000000e+00 : f32
      %c2 = arith.constant 2 : index
      %31 = memref.load %arg8[%c2] : memref<3xf32, #tpu.memory_space<smem>>
      memref.store %cst_20, %arg8[%c2] : memref<3xf32, #tpu.memory_space<smem>>
      %cst_21 = arith.constant 0.000000e+00 : f32
      %c0_22 = arith.constant 0 : index
      %c0_23 = arith.constant 0 : index
      %32 = memref.load %arg5[%c0_22, %c0_23] : memref<1x1xf32, #tpu.memory_space<smem>>
      memref.store %cst_21, %arg5[%c0_22, %c0_23] : memref<1x1xf32, #tpu.memory_space<smem>>
    } else {
    }
    %c0 = arith.constant 0 : index
    %c0_2 = arith.constant 0 : index
    %7 = vector.load %arg4[%c0, %c0_2] : memref<8x1xi32, #tpu.memory_space<vmem>>, vector<8x1xi32>
    %c0_3 = arith.constant 0 : index
    %c0_4 = arith.constant 0 : index
    %8 = vector.load %arg3[%c0_3, %c0_4] : memref<1x8xi32, #tpu.memory_space<vmem>>, vector<1x8xi32>
    %9 = vector.broadcast %7 : vector<8x1xi32> to vector<8x8xi32>
    %10 = vector.broadcast %8 : vector<1x8xi32> to vector<8x8xi32>
    %11 = arith.cmpi eq, %9, %10 : vector<8x8xi32>
    %c0_i32_5 = arith.constant 0 : i32
    %12 = arith.cmpi eq, %arg0, %c0_i32_5 : i32
    %13 = arith.extui %12 : i1 to i32
    %c0_i32_6 = arith.constant 0 : i32
    %14 = arith.cmpi ne, %13, %c0_i32_6 : i32
    scf.if %14 {
      %18 = arith.index_cast %1 : i32 to index
      %c0_8 = arith.constant 0 : index
      %19 = vector.load %arg2[%18, %c0_8] : memref<8x32xbf16, #tpu.memory_space<vmem>>, vector<8x32xbf16>
      %c0_9 = arith.constant 0 : index
      %c0_10 = arith.constant 0 : index
      %20 = vector.load %arg2[%c0_9, %c0_10] : memref<8x32xbf16, #tpu.memory_space<vmem>>, vector<8x32xbf16>
      %cst = arith.constant dense<0.000000e+00> : vector<8x8xf32>
      %21 = tpu.matmul %19, %20, %cst {dimension_numbers = #tpu.dot_dimension_numbers<[1], [1], [0], [0], [0, 0, 1, 0], [], []>} : vector<8x32xbf16>, vector<8x32xbf16>, vector<8x8xf32> -> vector<8x8xf32>
      %22 = arith.extf %19 : vector<8x32xbf16> to vector<8x32xf32>
      %23 = arith.mulf %22, %22 : vector<8x32xf32>
      %cst_11 = arith.constant dense<0.000000e+00> : vector<8xf32>
      %24 = vector.multi_reduction <add>, %23, %cst_11 [1] : vector<8x32xf32> to vector<8xf32>
      %25 = vector.shape_cast %24 : vector<8xf32> to vector<8x1xf32>
      %cst_12 = arith.constant 1.000000e-16 : f32
      %26 = vector.broadcast %cst_12 : f32 to vector<8x1xf32>
      %27 = arith.maximumf %25, %26 : vector<8x1xf32>
      %28 = math.rsqrt %27 : vector<8x1xf32>
      %29 = vector.broadcast %28 : vector<8x1xf32> to vector<8x8xf32>
      %30 = arith.mulf %21, %29 : vector<8x8xf32>
      %c0_13 = arith.constant 0 : index
      %c0_14 = arith.constant 0 : index
      %31 = vector.load %arg6[%c0_13, %c0_14] : memref<1x8xf32, #tpu.memory_space<vmem>>, vector<1x8xf32>
      %32 = vector.broadcast %31 : vector<1x8xf32> to vector<8x8xf32>
      %33 = arith.mulf %30, %32 : vector<8x8xf32>
      %34 = math.exp %33 : vector<8x8xf32>
      %cst_15 = arith.constant 0.000000e+00 : f32
      %35 = vector.broadcast %cst_15 : f32 to vector<8x8xf32>
      %36 = arith.select %11, %34, %35 : vector<8x8xi1>, vector<8x8xf32>
      %c0_16 = arith.constant 0 : index
      %c0_17 = arith.constant 0 : index
      %37 = vector.load %arg7[%c0_16, %c0_17] : memref<1x8xf32, #tpu.memory_space<vmem>>, vector<1x8xf32>
      %cst_18 = arith.constant dense<0.000000e+00> : vector<8xf32>
      %38 = vector.multi_reduction <add>, %36, %cst_18 [0] : vector<8x8xf32> to vector<8xf32>
      %39 = vector.shape_cast %38 : vector<8xf32> to vector<1x8xf32>
      %40 = arith.addf %37, %39 : vector<1x8xf32>
      %c0_19 = arith.constant 0 : index
      %c0_20 = arith.constant 0 : index
      %41 = vector.load %arg7[%c0_19, %c0_20] : memref<1x8xf32, #tpu.memory_space<vmem>>, vector<1x8xf32>
      tpu.vector_store %arg7[%c0_19, %c0_20], %40 {strides = array<i32>} : memref<1x8xf32, #tpu.memory_space<vmem>>, vector<1x8xf32>,
      %c0_21 = arith.constant 0 : index
      %42 = memref.load %arg8[%c0_21] : memref<3xf32, #tpu.memory_space<smem>>
      %cst_22 = arith.constant 0.000000e+00 : f32
      %43 = vector.broadcast %cst_22 : f32 to vector<8x8xf32>
      %44 = arith.select %11, %33, %43 : vector<8x8xi1>, vector<8x8xf32>
      %45 = vector.shape_cast %44 : vector<8x8xf32> to vector<1x8x8xf32>
      %cst_23 = arith.constant dense<0.000000e+00> : vector<1xf32>
      %46 = vector.multi_reduction <add>, %45, %cst_23 [1, 2] : vector<1x8x8xf32> to vector<1xf32>
      %47 = vector.shape_cast %46 : vector<1xf32> to vector<1x1x1xf32>
      %48 = vector.extract %47[0, 0, 0] : f32 from vector<1x1x1xf32>
      %49 = arith.addf %42, %48 : f32
      %c0_24 = arith.constant 0 : index
      %50 = memref.load %arg8[%c0_24] : memref<3xf32, #tpu.memory_space<smem>>
      memref.store %49, %arg8[%c0_24] : memref<3xf32, #tpu.memory_space<smem>>
    } else {
    }
    %c1_i32 = arith.constant 1 : i32
    %15 = arith.cmpi eq, %arg0, %c1_i32 : i32
    %16 = arith.extui %15 : i1 to i32
    %c0_i32_7 = arith.constant 0 : i32
    %17 = arith.cmpi ne, %16, %c0_i32_7 : i32
    scf.if %17 {
      %18 = arith.extui %11 : vector<8x8xi1> to vector<8x8xi32>
      %19 = arith.sitofp %18 : vector<8x8xi32> to vector<8x8xf32>
      %cst = arith.constant 1.000000e+00 : f32
      %20 = vector.broadcast %cst : f32 to vector<1x8xf32>
      %cst_8 = arith.constant dense<0.000000e+00> : vector<1x8xf32>
      %21 = tpu.matmul %20, %19, %cst_8 {dimension_numbers = #tpu.dot_dimension_numbers<[1], [1], [0], [0], [0, 0, 1, 0], [], []>} : vector<1x8xf32>, vector<8x8xf32>, vector<1x8xf32> -> vector<1x8xf32>
      %c0_9 = arith.constant 0 : index
      %c0_10 = arith.constant 0 : index
      %22 = vector.load %arg7[%c0_9, %c0_10] : memref<1x8xf32, #tpu.memory_space<vmem>>, vector<1x8xf32>
      %cst_11 = arith.constant dense<0.000000e+00> : vector<1x8xf32>
      %23 = tpu.matmul %22, %19, %cst_11 {dimension_numbers = #tpu.dot_dimension_numbers<[1], [1], [0], [0], [0, 0, 1, 0], [], []>} : vector<1x8xf32>, vector<8x8xf32>, vector<1x8xf32> -> vector<1x8xf32>
      %c1 = arith.constant 1 : index
      %24 = memref.load %arg8[%c1] : memref<3xf32, #tpu.memory_space<smem>>
      %cst_12 = arith.constant 1.000000e-30 : f32
      %25 = vector.broadcast %cst_12 : f32 to vector<1x8xf32>
      %26 = arith.maximumf %23, %25 : vector<1x8xf32>
      %27 = math.log %26 : vector<1x8xf32>
      %28 = arith.mulf %21, %27 : vector<1x8xf32>
      %29 = vector.shape_cast %28 : vector<1x8xf32> to vector<1x1x8xf32>
      %cst_13 = arith.constant dense<0.000000e+00> : vector<1xf32>
      %30 = vector.multi_reduction <add>, %29, %cst_13 [1, 2] : vector<1x1x8xf32> to vector<1xf32>
      %31 = vector.shape_cast %30 : vector<1xf32> to vector<1x1x1xf32>
      %32 = vector.extract %31[0, 0, 0] : f32 from vector<1x1x1xf32>
      %33 = arith.addf %24, %32 : f32
      %c1_14 = arith.constant 1 : index
      %34 = memref.load %arg8[%c1_14] : memref<3xf32, #tpu.memory_space<smem>>
      memref.store %33, %arg8[%c1_14] : memref<3xf32, #tpu.memory_space<smem>>
      %c2 = arith.constant 2 : index
      %35 = memref.load %arg8[%c2] : memref<3xf32, #tpu.memory_space<smem>>
      %36 = vector.shape_cast %21 : vector<1x8xf32> to vector<1x1x8xf32>
      %cst_15 = arith.constant dense<0.000000e+00> : vector<1xf32>
      %37 = vector.multi_reduction <add>, %36, %cst_15 [1, 2] : vector<1x1x8xf32> to vector<1xf32>
      %38 = vector.shape_cast %37 : vector<1xf32> to vector<1x1x1xf32>
      %39 = vector.extract %38[0, 0, 0] : f32 from vector<1x1x1xf32>
      %40 = arith.addf %35, %39 : f32
      %c2_16 = arith.constant 2 : index
      %41 = memref.load %arg8[%c2_16] : memref<3xf32, #tpu.memory_space<smem>>
      memref.store %40, %arg8[%c2_16] : memref<3xf32, #tpu.memory_space<smem>>
      %c0_i32_17 = arith.constant 0 : i32
      %42 = arith.cmpi eq, %arg1, %c0_i32_17 : i32
      %43 = arith.extui %42 : i1 to i32
      %c0_i32_18 = arith.constant 0 : i32
      %44 = arith.cmpi ne, %43, %c0_i32_18 : i32
      scf.if %44 {
        %c2_19 = arith.constant 2 : index
        %45 = memref.load %arg8[%c2_19] : memref<3xf32, #tpu.memory_space<smem>>
        %c1_20 = arith.constant 1 : index
        %46 = memref.load %arg8[%c1_20] : memref<3xf32, #tpu.memory_space<smem>>
        %c0_21 = arith.constant 0 : index
        %47 = memref.load %arg8[%c0_21] : memref<3xf32, #tpu.memory_space<smem>>
        %48 = arith.subf %46, %47 : f32
        %cst_22 = arith.constant 0.000000e+00 : f32
        %49 = arith.cmpf ogt, %45, %cst_22 : f32
        %50 = arith.divf %48, %45 : f32
        %cst_23 = arith.constant 0.000000e+00 : f32
        %51 = arith.select %49, %50, %cst_23 : f32
        %c0_24 = arith.constant 0 : index
        %c0_25 = arith.constant 0 : index
        %52 = memref.load %arg5[%c0_24, %c0_25] : memref<1x1xf32, #tpu.memory_space<smem>>
        memref.store %51, %arg5[%c0_24, %c0_25] : memref<1x1xf32, #tpu.memory_space<smem>>
      } else {
      }
    } else {
    }
    return
  }
  func.func @transform_0(%arg0: i32, %arg1: i32) -> (i32, i32) {
    %c0_i32 = arith.constant 0 : i32
    %c0_i32_0 = arith.constant 0 : i32
    %c0_i32_1 = arith.constant 0 : i32
    return %c0_i32, %c0_i32_0 : i32, i32
  }
  func.func @transform_1(%arg0: i32, %arg1: i32) -> (i32, i32) {
    %c0_i32 = arith.constant 0 : i32
    %c0_i32_0 = arith.constant 0 : i32
    %c0_i32_1 = arith.constant 0 : i32
    return %c0_i32, %c0_i32_0 : i32, i32
  }
  func.func @transform_2(%arg0: i32, %arg1: i32) -> (i32, i32) {
    %c0_i32 = arith.constant 0 : i32
    %c0_i32_0 = arith.constant 0 : i32
    return %arg1, %c0_i32 : i32, i32
  }
  func.func @transform_3(%arg0: i32, %arg1: i32) -> (i32, i32) {
    %c0_i32 = arith.constant 0 : i32
    %c0_i32_0 = arith.constant 0 : i32
    %c0_i32_1 = arith.constant 0 : i32
    return %c0_i32, %c0_i32_0 : i32, i32
  }
}

</mosaic_0001>

<bundles_post_ra>
// kernel: tpu_custom_call.1
= control target key start
LH: loop header
LB: loop body
LE: loop exit
PB: predicated region body
PF: predicated region fallthrough
CT: control target
= control target key end

     0   :  { %8 = vsyncpa [#allocation6], 0  ;;  %s829_s12 = smov 0   ;;  %s831_s13 = smov 0   ;;  %s908_s0 = inlined_call_operand.vmem [shape: bf16[8,32], index: 0, kind: input, shape index: {}]   ;;  %s909_s1 = inlined_call_operand.vmem [shape: s32[1,8], index: 1, kind: input, shape index: {}]   ;;  %s910_s2 = inlined_call_operand.vmem [shape: s32[8,1], index: 2, kind: input, shape index: {}]   ;;  %s911_s3 = inlined_call_operand.hbm [shape: f32[1,1], index: 3, kind: output, shape index: {}]  }
   0x1   :  { %s833_s14 = smov 0  }
   0x2 LB: > { %s643_s15 = sadd.s32 4294967295, %s796_s14   ;;  %s26_s16 = sadd.s32 1, %s792_s13  ;;  %s796_s14 = sphi %s833_s14, %s14_s14   ;;  %s792_s13 = sphi %s831_s13, %s913_s13   ;;  %s788_s12 = sphi %s829_s12, %s912_s12  }
   0x3   : > { %p28_p0 = scmp.ge.s32.totalorder %s26_s16, 2  ;;  %p646_p1 = scmp.ge.s32.totalorder %s796_s14, 1 }
   0x4   : > { %p144_p2 = scmp.lt.s32.totalorder %s796_s14, 3 }
   0x5   : > { %s915_s16 = smov (%p28_p0, %s26_s16), 0 }
   0x6   : > { %p145_p3 = pnand %p646_p1, %p144_p2 }
   0x7   : > { %p168_p4 = scmp.eq.s32.totalorder (!%p145_p3), %s788_s12, 0 }
   0x8   : > { %148 = sbr.rel (%p145_p3) target bundleno = 1212 (0x4bc), region = 32 }
   0xf   : > { %173 = sbr.rel (!%p168_p4) target bundleno = 249 (0xf9), region = 36  ;;  %vm256_vm0 = vcmask (%p168_p4), 57344   ;;  %v174_v0 = vld [vmem:[%s908_s0] sm:$0xf] (%p168_p4)  ;;  %v798_v1 = vmov (%p168_p4), 0.0   ;;  %vm799_vm1 = vmmov (%p168_p4), 0  }
  0x10   : > { %677 = vmatprep.subr.mxu0 (%p168_p4), %v798_v1  ;;  %258 = vst.msk [vmem:[#allocation3] sm:$0x1] (%p168_p4), %vm256_vm0, %v798_v1  ;;  %v175_v2 = vunpack.c.l.bf16 (%p168_p4), %v174_v0  ;;  %679 = vmatprep.mubr.msk.f32.mxu0 (%p168_p4), %vm799_vm1, %v798_v1  ;;  %vm177_vm2 = vcmask (%p168_p4), 261120   ;;  %v800_v4 = vmov (%p168_p4), 1.0   ;;  %s801_s19 = smov (%p168_p4), 0.0  }
  0x11   : > { %260 = sst [smem:[#allocation4]] (%p168_p4), %s801_s19 }
  0x12   : > { %v176_v3 = vmul.f32 (%p168_p4), %v175_v2, %v175_v2  ;;  %262 = sst [smem:[#allocation4 + $0x1]] (%p168_p4), %s801_s19 }
  0x13   : > { %264 = sst [smem:[#allocation4 + $0x2]] (%p168_p4), %s801_s19 }
  0x14   : > { %678 = vmatpush3.xpose.msk.msra.mxu0 (%p168_p4), %vm177_vm2, %v176_v3  ;;  %266 = sst [smem:[#allocation5]] (%p168_p4), %s801_s19 }
  0x17   : > { %680 = vmatmul.mubr.msk.f32.vlgmr.msra.gmra.mrb[0].mxu0 %vm177_vm2, %v800_v4 }
  0xea   : > { %v250_v5 = vpop.f32.mrb[0].mxu0 }
  0xeb   : > { %v254_v6 = vmax.f32 %v250_v5, 1e-16  ;;  %v681_v7 = vpop.f32.mrb[1].mxu0 }
  0xed   : > { %747 = vrsqrt.f32 %v254_v6 }
  0xf7   : > { %v748_v8 = vpop.eup %747 }
  0xf8   : > { %257 = vst.msk [vmem:[#allocation2] sm:$0x1] %vm256_vm0, %v748_v8 }
  0xf9 PF: > { %v267_v9 = vld [vmem:[%s910_s2] sm:$0xff]  ;;  %v802_v10 = vmov 0   ;;  %p651_p5 = scmp.ne.s32.totalorder %s788_s12, 0 }
  0xfa   : > { %749 = vset.pattern.permute.xlu0 %v802_v10  ;;  %v862_v11 = vld [vmem:[%s909_s1] ss:$0 sm:$0xff]  ;;  %vm286_vm4 = vcmask (!%p651_p5), 261120   ;;  %v803_v14 = vmov (!%p651_p5), 0.0   ;;  %vm804_vm5 = vmmov (!%p651_p5), 0   ;;  %vm353_vm6 = vcmask (!%p651_p5), 64512  }
  0xfb   : > { %270 = vperm.xlu0 %749, %v267_v9   ;;  %v285_v13 = vld [vmem:[%s908_s0] sm:$0xf] (!%p651_p5)  ;;  %682 = vmatprep.subr.bf16.mxu0 (!%p651_p5), %v803_v14  ;;  %vm362_vm7 = vcmask (!%p651_p5), 57344   ;;  %s364_s28 = sld [smem:[#allocation4]] (!%p651_p5) }
  0xfc   : > { %v291_v15 = vsel (!%p651_p5), %vm286_vm4, %v285_v13, 0  ;;  %684 = vmatprep.mubr.msk.bf16.mxu0 (!%p651_p5), %vm804_vm5, %v803_v14  ;;  %v284_v16 = vld [vmem:[%s908_s0] sm:$0xf] (!%p651_p5) }
  0xfd   : > { %683 = vmatpush3.bf16.xpose.msra.mxu0 (!%p651_p5), %v291_v15  ;;  %v333_v17 = vunpack.c.l.bf16 (!%p651_p5), %v284_v16  ;;  %v352_v41 = vld [vmem:[#allocation3] sm:$0x1] (!%p651_p5) }
  0xff   : > { %v334_v18 = vmul.f32 (!%p651_p5), %v333_v17, %v333_v17  ;;  %v653_v24 = vld [vmem:[#allocation2] ss:$0 sm:$0xff] (!%p651_p5) }
 0x101   : > { %v335_v19 = vsel (!%p651_p5), %vm286_vm4, %v334_v18, 0.0 }
 0x104   : > { %685 = vmatmul.mubr.msk.bf16.vlgmr.msra.gmra.mrb[0].mxu0 (!%p651_p5), %vm286_vm4, %v284_v16 }
 0x11a   : > { %336 = vadd.xlane.f32.xlu0 (!%p651_p5), %v335_v19 }
 0x175   : > { %279 = sbr.rel (%p651_p5) target bundleno = 685 (0x2ad), region = 40 }
 0x17a   : > { %v864_v12 = vpop.permute.xlu0 %270 }
 0x17b   : > { %vm276_vm3 = vcmp.eq.s32.totalorder %v864_v12, %v862_v11 }
 0x1a7   : > { %v337_v20 = vpop.xlane.xlu0 %336 }
 0x1a8   : > { %v338_v21 = vmax.f32 %v337_v20, 1e-16 }
 0x1aa   : > { %750 = vrsqrt.f32 %v338_v21 }
 0x1b4   : > { %v751_v22 = vpop.eup %750 }
 0x1d7   : > { %v327_v23 = vpop.f32.mrb[0].mxu0 }
 0x1d8   : > { %v340_v25 = vmul.f32 %v751_v22, %v327_v23  ;;  %v686_v26 = vpop.f32.mrb[1].mxu0 }
 0x1d9   : > { %v330_v27 = vpop.f32.mrb[2].mxu0 }
 0x1da   : > { %v348_v28 = vmul.f32 %v653_v24, %v340_v25  ;;  %v687_v29 = vpop.f32.mrb[3].mxu0 }
 0x1dc   : > { %v349_v30 = vmul.f32 1.442695, %v348_v28  ;;  %v365_v31 = vsel %vm276_vm3, %v348_v28, 0.0 }
 0x1dd   : > { %v366_v32 = vsel %vm353_vm6, %v365_v31, 0.0 }
 0x1de   : > { %752 = vpow2.f32 %v349_v30  ;;  %367 = vadd.xlane.f32.xlu0 %v366_v32 }
 0x1e8   : > { %v753_v33 = vpop.eup %752 }
 0x1e9   : > { %v351_v34 = vsel %vm276_vm3, %v753_v33, 0.0 }
 0x1ea   : > { %v354_v35 = vsel %vm353_vm6, %v351_v34, 0.0 }
 0x1eb   : > { %v355_v36 = vrot.slane %v354_v35, 4 }
 0x1ed   : > { %v356_v37 = vadd.f32 %v355_v36, %v354_v35 }
 0x1ef   : > { %v357_v38 = vrot.slane %v356_v37, 2 }
 0x1f1   : > { %v358_v39 = vadd.f32 %v357_v38, %v356_v37 }
 0x1f3   : > { %v359_v40 = vrot.slane %v358_v39, 1 }
 0x1f5   : > { %v360_v42 = vadd.f32 %v359_v40, %v358_v39 }
 0x1f7   : > { %v361_v43 = vadd.f32 %v360_v42, %v352_v41 }
 0x1f9   : > { %363 = vst.msk [vmem:[#allocation3] sm:$0x1] %vm362_vm7, %v361_v43 }
 0x26b   : > { %v368_v44 = vpop.xlane.xlu0 %367 }
 0x26c   : > { %v369_v45 = vrot.slane %v368_v44, 4 }
 0x26e   : > { %v370_v46 = vadd.f32 %v369_v45, %v368_v44 }
 0x270   : > { %v371_v47 = vrot.slane %v370_v46, 2 }
 0x272   : > { %v372_v48 = vadd.f32 %v371_v47, %v370_v46 }
 0x274   : > { %v373_v49 = vrot.slane %v372_v48, 1 }
 0x276   : > { %v374_v50 = vadd.f32 %v373_v49, %v372_v48 }
 0x278   : > { %698 = vpush %v374_v50 }
 0x2a9   : > { %s699_s29 = spop %698 }
 0x2aa   : > { %s376_s30 = sadd.f32 %s699_s29, %s364_s28 }
 0x2ac   : > { %378 = sst [smem:[#allocation4]] %s376_s30 }
 0x2ad PF: > { %p654_p6 = scmp.ne.s32.totalorder %s788_s12, 1 }
 0x2ae   : > { %vm385_vm8 = vcmask (!%p654_p6), 64512   ;;  %v805_v51 = vmov (!%p654_p6), 0.0   ;;  %vm806_vm9 = vmmov (!%p654_p6), 0   ;;  %v462_v53 = vld [vmem:[#allocation3] sm:$0x1] (!%p654_p6)  ;;  %v807_v54 = vmov (!%p654_p6), 1.0  }
 0x2af   : > { %382 = sbr.rel (%p654_p6) target bundleno = 1197 (0x4ad), region = 44  ;;  %693 = vmatprep.subr.mxu1 (!%p654_p6), %v805_v51  ;;  %v655_v52 = vsel (!%p654_p6), %vm276_vm3, 1.0, %v805_v51  ;;  %695 = vmatprep.mubr.msk.f32.mxu1 (!%p654_p6), %vm806_vm9, %v805_v51  ;;  %vm541_vm10 = vcmask (!%p654_p6), 57344   ;;  %s660_s4 = sld [smem:[#allocation4 + $0x1]] (!%p654_p6) }
 0x2b0   : > { %694 = vmatpush3.xpose.msk.msra.mxu1 (!%p654_p6), %vm385_vm8, %v655_v52  ;;  %688 = vmatprep.subr.mxu0 (!%p654_p6), %v805_v51  ;;  %s661_s5 = sld [smem:[#allocation4 + $0x2]] (!%p654_p6)  ;;  %s574_s10 = sld [smem:[#allocation4]] (!%p654_p6) }
 0x2b1   : > { %689 = vmatpush3.xpose.msk.msra.mxu0 (!%p654_p6), %vm385_vm8, %v655_v52  ;;  %690 = vmatprep.mubr.msk.f32.mxu0 (!%p654_p6), %vm806_vm9, %v805_v51 }
 0x2b3   : > { %696 = vmatmul.mubr.msk.f32.vlgmr.msra.gmra.mrb[0].mxu1 (!%p654_p6), %vm385_vm8, %v462_v53 }
 0x2b4   : > { %691 = vmatmul.mubr.msk.f32.vlgmr.msra.gmra.mrb[0].mxu0 (!%p654_p6), %vm385_vm8, %v807_v54 }
 0x386   : > { %v532_v55 = vpop.f32.mrb[0].mxu1 }
 0x387   : > { %v537_v56 = vmax.f32 %v532_v55, 1e-30  ;;  %v697_v57 = vpop.f32.mrb[1].mxu1  ;;  %v458_v58 = vpop.f32.mrb[0].mxu0 }
 0x388   : > { %v692_v59 = vpop.f32.mrb[1].mxu0  ;;  %v556_v0 = vsel %vm541_vm10, %v458_v58, 0.0 }
 0x389   : > { %754 = vlog2.f32 %v537_v56 }
 0x393   : > { %v755_v60 = vpop.eup %754 }
 0x394   : > { %v539_v61 = vmul.f32 0.6931472, %v755_v60 }
 0x396   : > { %v540_v62 = vmul.f32 %v539_v61, %v458_v58 }
 0x398   : > { %v542_v63 = vsel %vm541_vm10, %v540_v62, 0.0 }
 0x399   : > { %543 = vadd.xlane.f32.xlu0 %v542_v63 }
 0x39d   : > { %557 = vadd.xlane.f32.xlu0 %v556_v0 }
 0x426   : > { %v544_v1 = vpop.xlane.xlu0 %543 }
 0x427   : > { %v545_v2 = vrot.slane %v544_v1, 4 }
 0x429   : > { %v546_v3 = vadd.f32 %v545_v2, %v544_v1 }
 0x42a   : > { %v558_v4 = vpop.xlane.xlu0 %557 }
 0x42b   : > { %v547_v5 = vrot.slane %v546_v3, 2  ;;  %v559_v6 = vrot.slane %v558_v4, 4 }
 0x42d   : > { %v560_v7 = vadd.f32 %v559_v6, %v558_v4  ;;  %v548_v8 = vadd.f32 %v547_v5, %v546_v3 }
 0x42f   : > { %v561_v9 = vrot.slane %v560_v7, 2  ;;  %v549_v10 = vrot.slane %v548_v8, 1 }
 0x431   : > { %v562_v11 = vadd.f32 %v561_v9, %v560_v7  ;;  %v550_v12 = vadd.f32 %v549_v10, %v548_v8 }
 0x433   : > { %700 = vpush %v550_v12  ;;  %v563_v13 = vrot.slane %v562_v11, 1 }
 0x435   : > { %v564_v14 = vadd.f32 %v563_v13, %v562_v11 }
 0x437   : > { %702 = vpush %v564_v14 }
 0x464   : > { %s701_s6 = spop %700 }
 0x465   : > { %s552_s7 = sadd.f32 %s701_s6, %s660_s4 }
 0x467   : > { %554 = sst [smem:[#allocation4 + $0x1]] %s552_s7 }
 0x468   : > { %s703_s8 = spop %702  ;;  %s575_s11 = ssub.f32 %s552_s7, %s574_s10 }
 0x469   : > { %s566_s9 = sadd.f32 %s703_s8, %s661_s5 }
 0x46b   : > { %568 = sst [smem:[#allocation4 + $0x2]] %s566_s9  ;;  %v577_v15 = vstv %s566_s9  ;;  %p576_p7 = scmp.gt.f32.partialorder %s566_s9, 0.0 }
 0x46c   : > { %756 = vrcp.f32 %v577_v15 }
 0x476   : > { %v757_v16 = vpop.eup %756 }
 0x477   : > { %704 = vpush %v757_v16 }
 0x4a8   : > { %s705_s12 = spop %704 }
 0x4a9   : > { %s580_s17 = smul.f32 %s705_s12, %s575_s11 }
 0x4ab   : > { %s917_s17 = smov (!%p576_p7, %s580_s17), 0.0 }
 0x4ac   : > { %583 = sst [smem:[#allocation5]] %s917_s17 }
 0x4ad PF: > { %p710_p8 = scmp.eq.s32.totalorder %s643_s15, 1  ;;  %s758_s20 = scalar_lea.hbm %s911_s3, 16 }
 0x4ae   : > { %p759_p9 = scmp.ne.s32.totalorder %s911_s3, %s758_s20  ;;  %p764_p12 = scmp.lt.u32.totalorder %s758_s20, %s911_s3 }
 0x4b0   : > { %p760_p10 = pnand %p759_p9, %p710_p8 }
 0x4b2   : > { %p761_p11 = pneg %p760_p10 }
 0x4b4   : > { %p766_p13 = pnand %p764_p12, %p761_p11 }
 0x4b6   : > { %769 = shalt.err (!%p766_p13)
}
 0x4b7   : > { %s808_s25 = smov [#allocation5]  }
 0x4b8   : > { %707 = dma.smem_to_hbm (%p710_p8), %s808_s25, 16, %s911_s3, [#allocation6]  }
 0x4b9   : > { %783 = dma.done.wait (%p710_p8), [#allocation6], 16  }
 0x4ba   : > { %785 = vsyncadd (%p710_p8), [#allocation6], 4294967280 }
 0x4bb   : > { %597 = sfence }
 0x4bc PF: > { %s14_s14 = sadd.s32 1, %s796_s14   ;;  %s912_s12 = smov %s792_s13 }
 0x4bd   : > { %p11_p0 = scmp.ge.s32.totalorder %s14_s14, 4   ;;  %s913_s13 = smov %s915_s16 }
 0x4bf   :  { %13 = sbr.rel (!%p11_p0) target bundleno = 2 (0x2), region = 84 }
 0x4c6   :  { %603 = vsyncpa [#allocation6], 1 }
 0x4c7   :  { %605 = vsyncpa [#allocation6 + $0x1], 1 }

</bundles_post_ra>
